<compile_context>
chip_gen: v7x
topology: tpu7x:2x2x1
jax: 0.10.0
libtpu: 0.0.40
codegen_flags: <defaults>
</compile_context>

<pallas_src>
import jax
import jax.numpy as jnp
from jax import lax
from jax.experimental import pallas as pl
from jax.experimental.pallas import tpu as pltpu

HIDDEN = 256
MAX_TILE_B = 512  # ~85% of HBM roofline per measured tiling guidance


def _round_up(x, m):
    return -(-x // m) * m


def _choose_tile_b(batch, max_tb=MAX_TILE_B):
    """Pick the batch tile.

    Small/medium batch: one grid step covering the whole (8-rounded) batch,
    since per-grid-step overhead (~0.35 us) dominates tiny tiles.  Large
    batch: ~max_tb rows rounded to a multiple of 128 (aligned, unmasked
    lane-dense output stores), with the tile count nudged toward an even
    number so both v7x TensorCores get work.
    """
    b8 = _round_up(batch, 8)
    if b8 <= max_tb:
        return b8
    n = _round_up(-(-batch // max_tb), 2)  # even tile-count target (v7x megacore)
    return _round_up(-(-batch // n), 128)


def critic_kernel(x_ref, w1_ref, b1_ref, w2_ref, b2_ref, o_ref):
    # fc1 + ReLU: MXU matmul with f32 accumulation, bias add + ReLU on VPU.
    h = jnp.dot(x_ref[...], w1_ref[...], preferred_element_type=jnp.float32)
    h = jnp.maximum(h + b1_ref[...], 0.0)                     # (tb, 256)

    # fc2: contract the hidden dim of the (1, 256) weight row against the
    # hidden dim of h -> (1, tb).  Result is lane-dense (rows of the batch
    # live along lanes), so the store below is a plain unmasked vst.
    v = lax.dot_general(
        w2_ref[...], h,
        dimension_numbers=(((1,), (1,)), ((), ())),
        preferred_element_type=jnp.float32,
    )                                                          # (1, tb)

    # b2 is a scalar living in SMEM.
    o_ref[...] = (v + b2_ref[0, 0]).astype(o_ref.dtype)


def critic_forward(state, w1, b1, w2, b2, *, max_tb=MAX_TILE_B):
    """state: (B, state_dim) f32 -> (B, 1) f32."""
    B, state_dim = state.shape
    hidden = w1.shape[1]

    tb = _choose_tile_b(B, max_tb)
    n_tiles = pl.cdiv(B, tb)

    b1_row = jnp.reshape(b1, (1, hidden))
    w2_row = jnp.reshape(w2, (1, hidden))   # (256, 1) -> (1, 256) weight row
    b2_sc = jnp.reshape(b2, (1, 1))

    # Scoped-VMEM budget: double-buffered activation stream + output tiles,
    # the (tb, hidden) f32 intermediate (with slack), and the resident
    # weights.  Floor at 32 MiB so we never go below the platform defaults.
    need = (2 * tb * state_dim * 4          # x stream (double-buffered)
            + 2 * tb * 4                    # output tiles (double-buffered)
            + 4 * tb * hidden * 4           # hidden intermediate + headroom
            + 2 * (state_dim * hidden * 4 + 2 * hidden * 4))  # weights/biases
    vmem_limit = int(min(max(need, 32 * 1024 * 1024), 100 * 1024 * 1024))

    out = pl.pallas_call(
        critic_kernel,
        # Lane-dense output: one row of length n_tiles*tb; tile i writes the
        # (1, tb) column slab at offset i*tb.
        out_shape=jax.ShapeDtypeStruct((1, n_tiles * tb), jnp.float32),
        grid=(n_tiles,),
        in_specs=[
            # activation stream: re-DMA'd (and double-buffered) per tile;
            # the tail tile may read past B -- those rows are discarded below.
            pl.BlockSpec((tb, state_dim), lambda i: (i, 0)),
            # weights/biases: constant block index -> DMA'd once, VMEM-resident
            pl.BlockSpec((state_dim, hidden), lambda i: (0, 0)),
            pl.BlockSpec((1, hidden), lambda i: (0, 0)),
            pl.BlockSpec((1, hidden), lambda i: (0, 0)),
            # scalar bias in SMEM (no padded VMEM tile, no vreg broadcast)
            pl.BlockSpec(memory_space=pltpu.MemorySpace.SMEM),
        ],
        out_specs=pl.BlockSpec((1, tb), lambda i: (0, i)),
        compiler_params=pltpu.CompilerParams(
            dimension_semantics=("parallel",),   # megacore-shard batch on v7x
            vmem_limit_bytes=vmem_limit,
        ),
    )(state, w1, b1_row, w2_row, b2_sc)

    return jnp.reshape(out, (n_tiles * tb, 1))[:B]


def init_params(key, state_dim):
    """Deterministic init mirroring nn.Linear's U(-1/sqrt(fan_in), 1/sqrt(fan_in))."""
    k1, k2, k3, k4 = jax.random.split(key, 4)
    lim1 = 1.0 / jnp.sqrt(jnp.float32(state_dim))
    lim2 = 1.0 / jnp.sqrt(jnp.float32(HIDDEN))
    w1 = jax.random.uniform(k1, (state_dim, HIDDEN), jnp.float32, -lim1, lim1)
    b1 = jax.random.uniform(k2, (HIDDEN,), jnp.float32, -lim1, lim1)
    w2 = jax.random.uniform(k3, (HIDDEN, 1), jnp.float32, -lim2, lim2)
    b2 = jax.random.uniform(k4, (1,), jnp.float32, -lim2, lim2)
    return w1, b1, w2, b2


def _reference(state, w1, b1, w2, b2):
    return jnp.maximum(state @ w1 + b1[None, :], 0.0) @ w2 + b2[None, :]


if __name__ == "__main__":
    key = jax.random.PRNGKey(0)
    k_params, k_s1, k_s2 = jax.random.split(key, 3)

    STATE_DIM = 32
    w1, b1, w2, b2 = init_params(k_params, STATE_DIM)

    # Small batch -> single grid step sized to the batch (no padding pass).
    state_small = jax.random.normal(k_s1, (8, STATE_DIM), jnp.float32)
    out_small = jax.block_until_ready(critic_forward(state_small, w1, b1, w2, b2))
    ref_small = _reference(state_small, w1, b1, w2, b2)
    assert out_small.shape == (8, 1)
    assert jnp.allclose(out_small, ref_small, atol=1e-5, rtol=1e-5)

    # Medium batch, non-multiple of 8/128 -> still one grid step (tb=304).
    state_big = jax.random.normal(k_s2, (300, STATE_DIM), jnp.float32)
    out_big = jax.block_until_ready(critic_forward(state_big, w1, b1, w2, b2))
    ref_big = _reference(state_big, w1, b1, w2, b2)
    assert out_big.shape == (300, 1)
    assert jnp.allclose(out_big, ref_big, atol=1e-5, rtol=1e-5)

    # Force the multi-tile path (grid > 1, unpadded tail tile) at small size.
    out_multi = jax.block_until_ready(
        critic_forward(state_big, w1, b1, w2, b2, max_tb=128))
    assert out_multi.shape == (300, 1)
    assert jnp.allclose(out_multi, ref_big, atol=1e-5, rtol=1e-5)

    print("KERNEL_OK")
</pallas_src>

<mosaic_0001>
module attributes {stable_mosaic.version = 11 : i64} {
  func.func @critic_kernel(%arg0: i32, %arg1: memref<8x32xf32, #tpu.memory_space<vmem>>, %arg2: memref<32x256xf32, #tpu.memory_space<vmem>>, %arg3: memref<1x256xf32, #tpu.memory_space<vmem>>, %arg4: memref<1x256xf32, #tpu.memory_space<vmem>>, %arg5: memref<1x1xf32, #tpu.memory_space<smem>>, %arg6: memref<1x8xf32, #tpu.memory_space<vmem>>) attributes {dimension_semantics = [#tpu.dimension_semantics<parallel>], iteration_bounds = array<i64: 1>, scalar_prefetch = 0 : i64, scratch_operands = 0 : i64, tpu.core_type = #tpu.core_type<tc>, window_params = [{transform_indices = @transform_0, window_bounds = array<i64: 8, 32>}, {pipeline_mode = #tpu.pipeline_mode<synchronous>, transform_indices = @transform_1, window_bounds = array<i64: 32, 256>}, {pipeline_mode = #tpu.pipeline_mode<synchronous>, transform_indices = @transform_2, window_bounds = array<i64: 1, 256>}, {pipeline_mode = #tpu.pipeline_mode<synchronous>, transform_indices = @transform_3, window_bounds = array<i64: 1, 256>}, {transform_indices = @transform_4, window_bounds = array<i64: 1, 1>}, {transform_indices = @transform_5, window_bounds = array<i64: 1, 8>}]} {
    %c0 = arith.constant 0 : index
    %c0_0 = arith.constant 0 : index
    %0 = vector.load %arg1[%c0, %c0_0] : memref<8x32xf32, #tpu.memory_space<vmem>>, vector<8x32xf32>
    %c0_1 = arith.constant 0 : index
    %c0_2 = arith.constant 0 : index
    %1 = vector.load %arg2[%c0_1, %c0_2] : memref<32x256xf32, #tpu.memory_space<vmem>>, vector<32x256xf32>
    %cst = arith.constant dense<0.000000e+00> : vector<8x256xf32>
    %2 = tpu.matmul %0, %1, %cst {dimension_numbers = #tpu.dot_dimension_numbers<[1], [0], [0], [1], [0, 0, 1, 1], [], []>} : vector<8x32xf32>, vector<32x256xf32>, vector<8x256xf32> -> vector<8x256xf32>
    %c0_3 = arith.constant 0 : index
    %c0_4 = arith.constant 0 : index
    %3 = vector.load %arg3[%c0_3, %c0_4] : memref<1x256xf32, #tpu.memory_space<vmem>>, vector<1x256xf32>
    %4 = vector.broadcast %3 : vector<1x256xf32> to vector<8x256xf32>
    %5 = arith.addf %2, %4 : vector<8x256xf32>
    %cst_5 = arith.constant 0.000000e+00 : f32
    %6 = vector.broadcast %cst_5 : f32 to vector<8x256xf32>
    %7 = arith.maximumf %5, %6 : vector<8x256xf32>
    %c0_6 = arith.constant 0 : index
    %c0_7 = arith.constant 0 : index
    %8 = vector.load %arg4[%c0_6, %c0_7] : memref<1x256xf32, #tpu.memory_space<vmem>>, vector<1x256xf32>
    %cst_8 = arith.constant dense<0.000000e+00> : vector<1x8xf32>
    %9 = tpu.matmul %8, %7, %cst_8 {dimension_numbers = #tpu.dot_dimension_numbers<[1], [1], [0], [0], [0, 0, 1, 0], [], []>} : vector<1x256xf32>, vector<8x256xf32>, vector<1x8xf32> -> vector<1x8xf32>
    %c0_9 = arith.constant 0 : index
    %c0_10 = arith.constant 0 : index
    %10 = memref.load %arg5[%c0_9, %c0_10] : memref<1x1xf32, #tpu.memory_space<smem>>
    %11 = vector.broadcast %10 : f32 to vector<1x8xf32>
    %12 = arith.addf %9, %11 : vector<1x8xf32>
    %c0_11 = arith.constant 0 : index
    %c0_12 = arith.constant 0 : index
    %13 = vector.load %arg6[%c0_11, %c0_12] : memref<1x8xf32, #tpu.memory_space<vmem>>, vector<1x8xf32>
    tpu.vector_store %arg6[%c0_11, %c0_12], %12 {strides = array<i32>} : memref<1x8xf32, #tpu.memory_space<vmem>>, vector<1x8xf32>,
    return
  }
  func.func @transform_0(%arg0: i32) -> (i32, i32) {
    %c0_i32 = arith.constant 0 : i32
    %c0_i32_0 = arith.constant 0 : i32
    return %arg0, %c0_i32 : i32, i32
  }
  func.func @transform_1(%arg0: i32) -> (i32, i32) {
    %c0_i32 = arith.constant 0 : i32
    %c0_i32_0 = arith.constant 0 : i32
    %c0_i32_1 = arith.constant 0 : i32
    return %c0_i32, %c0_i32_0 : i32, i32
  }
  func.func @transform_2(%arg0: i32) -> (i32, i32) {
    %c0_i32 = arith.constant 0 : i32
    %c0_i32_0 = arith.constant 0 : i32
    %c0_i32_1 = arith.constant 0 : i32
    return %c0_i32, %c0_i32_0 : i32, i32
  }
  func.func @transform_3(%arg0: i32) -> (i32, i32) {
    %c0_i32 = arith.constant 0 : i32
    %c0_i32_0 = arith.constant 0 : i32
    %c0_i32_1 = arith.constant 0 : i32
    return %c0_i32, %c0_i32_0 : i32, i32
  }
  func.func @transform_4(%arg0: i32) -> (i32, i32) {
    %c0_i32 = arith.constant 0 : i32
    %c0_i32_0 = arith.constant 0 : i32
    %c0_i32_1 = arith.constant 0 : i32
    return %c0_i32, %c0_i32_0 : i32, i32
  }
  func.func @transform_5(%arg0: i32) -> (i32, i32) {
    %c0_i32 = arith.constant 0 : i32
    %c0_i32_0 = arith.constant 0 : i32
    return %c0_i32, %arg0 : i32, i32
  }
}

</mosaic_0001>

<bundles_post_ra>
// kernel: tpu_custom_call.1
= control target key start
LH: loop header
LB: loop body
LE: loop exit
PB: predicated region body
PF: predicated region fallthrough
CT: control target
= control target key end

     0   :  { %11 = vsyncpa [#allocation4], 0  ;;  %s423_s0 = inlined_call_operand.hbm [shape: f32[8,32], index: 0, kind: input, shape index: {}]   ;;  %s424_s1 = inlined_call_operand.hbm [shape: f32[32,256], index: 1, kind: input, shape index: {}]   ;;  %s425_s2 = inlined_call_operand.vmem [shape: f32[1,256], index: 2, kind: input, shape index: {}]   ;;  %s426_s3 = inlined_call_operand.vmem [shape: f32[1,256], index: 3, kind: input, shape index: {}]   ;;  %s427_s4 = inlined_call_operand.<no memory space> [shape: f32[1,1], index: 4, kind: input, shape index: {}]   ;;  %s428_s5 = inlined_call_operand.hbm [shape: f32[1,8], index: 5, kind: output, shape index: {}]  }
   0x1   :  { %12 = vsyncpa [#allocation7], 0 }
   0x2   :  { %13 = vsyncpa [#allocation5], 0  ;;  %s335_s18 = smov [#allocation3]   ;;  %s336_s20 = smov [#allocation6]  }
   0x3   :  { %s20_s19 = sshll.u32 %s335_s18, 4  ;;  %s29_s21 = sshll.u32 %s336_s20, 4  ;;  %s21_s19 = int_to_ptr.vmem [resolvable:$true] %s20_s19  ;;  %s371_s21 = int_to_ptr.vmem [resolvable:$true] %s29_s21 }
   0x4   :  { %s263_s24 = scalar_lea.hbm %s423_s0, 128 }
   0x5   :  { %p264_p0 = scmp.ne.s32.totalorder %s423_s0, %s263_s24  ;;  %p267_p1 = scmp.lt.u32.totalorder %s263_s24, %s423_s0 }
   0x7   :  { %p269_p2 = pnand %p267_p1, %p264_p0 }
   0x9   :  { %272 = shalt.err (!%p269_p2)
}
   0xa   :  { %s273_s29 = scalar_lea.vmem %s21_s19, 128  ;;  %p278_p4 = scmp.lt.s32.totalorder %s21_s19, %s21_s19 }
   0xb   :  { %p274_p3 = scmp.ne.s32.totalorder %s21_s19, %s273_s29  ;;  %p279_p5 = scmp.lt.s32.totalorder %s273_s29, %s273_s29 }
   0xd   :  { %p280_p6 = por %p279_p5, %p278_p4 }
   0xf   :  { %p281_p7 = pnand %p280_p6, %p274_p3 }
  0x11   :  { %284 = shalt.err (!%p281_p7)
}
  0x12   :  { %23 = dma.hbm_to_vmem [thread:$0]  %s423_s0, 128, %s21_s19, [#allocation4]  }
  0x13   :  { %s285_s9 = scalar_lea.hbm %s424_s1, 1024 }
  0x14   :  { %p286_p8 = scmp.ne.s32.totalorder %s424_s1, %s285_s9  ;;  %p289_p9 = scmp.lt.u32.totalorder %s285_s9, %s424_s1 }
  0x16   :  { %p291_p10 = pnand %p289_p9, %p286_p8 }
  0x18   :  { %294 = shalt.err (!%p291_p10)
}
  0x19   :  { %s295_s14 = scalar_lea.vmem %s371_s21, 1024  ;;  %p300_p12 = scmp.lt.s32.totalorder %s371_s21, %s371_s21 }
  0x1a   :  { %p296_p11 = scmp.ne.s32.totalorder %s371_s21, %s295_s14  ;;  %p301_p13 = scmp.lt.s32.totalorder %s295_s14, %s295_s14 }
  0x1c   :  { %p302_p0 = por %p301_p13, %p300_p12 }
  0x1e   :  { %p303_p1 = pnand %p302_p0, %p296_p11 }
  0x20   :  { %306 = shalt.err (!%p303_p1)
}
  0x21   :  { %s337_s0 = smov 256   ;;  %s338_s15 = smov 16  }
  0x22   :  { %35 = dma.hbm_to_vmem [thread:$0]  %s424_s1, 1024, %s371_s21, [#allocation7], %s337_s0, %s337_s0, %s338_s15  }
  0x23   :  { %329 = dma.done.wait [#allocation4], 128  }
  0x24   :  { %330 = vsyncadd [#allocation4], 4294967168 }
  0x25   :  { %331 = dma.done.wait [#allocation7], 1024  }
  0x26   :  { %332 = vsyncadd [#allocation7], 4294966272  ;;  %v339_v0 = vmov 0.0   ;;  %v50_v1 = vld [vmem:[#allocation6 + $0x8] sm:$0xff]  ;;  %v52_v2 = vld [vmem:[#allocation6 + $0x18] sm:$0xff]  ;;  %vm69_vm0 = vcmask 261120   ;;  %v59_v14 = vlaneseq  ;;  %v148_v30 = vstv %s427_s4 }
  0x27   :  { %137 = vmatprep.mubr.f32.mxu0 %v339_v0  ;;  %v49_v3 = vld [vmem:[#allocation6] sm:$0xff]  ;;  %v249_v4 = vpack.c.bf16 %v52_v2, %v50_v1  ;;  %v51_v5 = vld [vmem:[#allocation6 + $0x10] sm:$0xff]  ;;  %v54_v6 = vld [vmem:[#allocation6 + $0x28] sm:$0xff]  ;;  %s340_s22 = smov [#allocation8]   ;;  %vm230_vm1 = vcmask 57344  }
  0x28   :  { %v56_v7 = vld [vmem:[#allocation6 + $0x38] sm:$0xff]  ;;  %v251_v8 = vpack.c.bf16 %v51_v5, %v49_v3  ;;  %v53_v10 = vld [vmem:[#allocation6 + $0x20] sm:$0xff]  ;;  %v55_v11 = vld [vmem:[#allocation6 + $0x30] sm:$0xff]  ;;  %v60_v15 = vshrl.u32 %v59_v14, 7  ;;  %s238_s23 = sshll.u32 %s340_s22, 4  ;;  %s239_s23 = int_to_ptr.vmem [resolvable:$true] %s238_s23 }
  0x29   :  { %v253_v9 = vpack.c.bf16 %v56_v7, %v54_v6  ;;  %250 = vmatprep.subr.bf16.mxu0 %v249_v4  ;;  %v255_v12 = vpack.c.bf16 %v55_v11, %v53_v10  ;;  %v48_v13 = vld [vmem:[#allocation3] sm:$0xff]  ;;  %s311_s24 = scalar_lea.vmem %s239_s23, 32  ;;  %p312_p3 = scmp.lt.s32.totalorder %s239_s23, %s239_s23 }
  0x2a   :  { %252 = vmatpush1.bf16.msra.mxu0 %v251_v8  ;;  %v65_v16 = vsub.s32 1, %v60_v15  ;;  %v146_v17 = vld [vmem:[%s426_s3] sm:$0x3]  ;;  %v61_v19 = vsub.s32 0, %v60_v15 }
  0x2b   :  { %254 = vmatprep.subr.bf16.mxu0 %v253_v9  ;;  %v57_v20 = vld [vmem:[%s425_s2] sm:$0x3]  ;;  %s307_s2 = scalar_lea.vmem %s239_s23, 16 }
  0x2c   :  { %v157_v18 = vrot.slane %v146_v17, %v65_v16  ;;  %v62_v21 = vrot.slane %v57_v20, %v61_v19  ;;  %v66_v22 = vrot.slane %v57_v20, %v65_v16  ;;  %v153_v29 = vrot.slane %v146_v17, %v61_v19  ;;  %p308_p2 = scmp.ne.s32.totalorder %s239_s23, %s307_s2  ;;  %p313_p4 = scmp.lt.s32.totalorder %s311_s24, %s307_s2 }
  0x2e   :  { %256 = vmatpush1.bf16.msra.mxu0 %v255_v12  ;;  %224 = vmatprep.mubr.f32.mxu1 %v157_v18  ;;  %p314_p5 = por %p313_p4, %p312_p3 }
  0x30   :  { %p315_p6 = pnand %p314_p5, %p308_p2 }
  0x31   :  { %248 = vmatmul.mubr.msk.f32.vlgmr.msra.gmra.mrb[0].mxu0 %vm69_vm0, %v48_v13 }
 0x104   :  { %v139_v23 = vpop.f32.mrb[0].mxu0 }
 0x105   :  { %v140_v24 = vadd.f32 %v139_v23, %v62_v21  ;;  %v141_v25 = vpop.f32.mrb[1].mxu0 }
 0x106   :  { %v142_v26 = vadd.f32 %v141_v25, %v66_v22 }
 0x107   :  { %v144_v28 = vmax.f32 %v140_v24, 0.0 }
 0x108   :  { %v145_v27 = vmax.f32 %v142_v26, 0.0 }
 0x10a   :  { %160 = vmatprep.subr.mxu1 %v145_v27 }
 0x10b   :  { %161 = vmatpush1.xpose.msra.mxu1 %v144_v28 }
 0x10e   :  { %225 = vmatmul.mubr.f32.vlgmr.msra.gmra.mrb[0].mxu1 %v153_v29 }
 0x1e1   :  { %v226_v31 = vpop.f32.mrb[0].mxu1 }
 0x1e2   :  { %v227_v32 = vadd.f32 %v226_v31, %v148_v30  ;;  %v228_v33 = vpop.f32.mrb[1].mxu1 }
 0x1e4   :  { %231 = vst.msk [vmem:[#allocation8] sm:$0x1] %vm230_vm1, %v227_v32 }
 0x1e5   :  { %318 = shalt.err (!%p315_p6)
}
 0x1e6   :  { %s319_s4 = scalar_lea.hbm %s428_s5, 16 }
 0x1e7   :  { %p320_p7 = scmp.ne.s32.totalorder %s428_s5, %s319_s4  ;;  %p323_p8 = scmp.lt.u32.totalorder %s319_s4, %s428_s5 }
 0x1e9   :  { %p325_p9 = pnand %p323_p8, %p320_p7 }
 0x1eb   :  { %328 = shalt.err (!%p325_p9)
}
 0x1ec   :  { %241 = dma.vmem_to_hbm [thread:$0]  %s239_s23, 16, %s428_s5, [#allocation5]  }
 0x1ed   :  { %333 = dma.done.wait [#allocation5], 16  }
 0x1ee   :  { %334 = vsyncadd [#allocation5], 4294967280 }
 0x1ef   :  { %245 = vsyncpa [#allocation4], 1 }
 0x1f0   :  { %246 = vsyncpa [#allocation7], 1 }
 0x1f1   :  { %247 = vsyncpa [#allocation5], 1 }

</bundles_post_ra>
